<compile_context>
chip_gen: v5e
topology: v5e:2x2
jax: 0.10.0
libtpu: 0.0.40
codegen_flags: <defaults>
</compile_context>

<pallas_src>
import numpy as np
import jax
import jax.numpy as jnp
from jax.experimental import pallas as pl
from jax.experimental.pallas import tpu as pltpu

OUT_HW = 224                 # F.interpolate target size
PATCH = 16                   # stand-in backbone patch size
GRID_HW = OUT_HW // PATCH    # 14 tokens per side
PPF = PATCH * PATCH          # 256 pooled features per channel
NUM_FEATURES = 3072          # self.features.num_features
HEAD_OUT = 1 + 3 + 4         # energy(1) + alpha(3) + q0(4)
HEAD_PAD = 128               # lane-dense padded head width (real outputs in [:, :8])


# ----------------------------------------------------------------------------
# Host-side constant-matrix construction (numpy on static shapes -> baked
# compile-time constants; zero per-call cost).
# ----------------------------------------------------------------------------
def _bilinear_matrix(in_size, out_size):
    """PyTorch-compatible bilinear interpolation matrix (align_corners=False)."""
    scale = in_size / out_size
    out_idx = np.arange(out_size, dtype=np.float64)
    src = np.maximum((out_idx + 0.5) * scale - 0.5, 0.0)
    i0 = np.minimum(np.floor(src).astype(np.int64), in_size - 1)
    i1 = np.minimum(i0 + 1, in_size - 1)
    w1 = src - i0
    w0 = 1.0 - w1
    m = np.zeros((out_size, in_size), dtype=np.float64)
    np.add.at(m, (np.arange(out_size), i0), w0)
    np.add.at(m, (np.arange(out_size), i1), w1)
    return m


def _patch_pool_matrix():
    """P (16,224): averages each within-patch position over the 14x14 grid
    (1/14 per side; the two-sided product gives the 1/196 token mean)."""
    o = np.arange(OUT_HW)
    p = np.zeros((PATCH, OUT_HW), dtype=np.float64)
    p[o % PATCH, o] = 1.0 / GRID_HW
    return p


def _pool_resize_factors(h, w):
    """M_h (16,h), M_w (w,16) such that M_h @ x @ M_w == token-mean over the
    14x14 grid of the 224x224 bilinear resize of x (224 intermediate removed)."""
    a_h = _bilinear_matrix(h, OUT_HW)            # (224, h)
    a_w = _bilinear_matrix(w, OUT_HW)            # (224, w)
    p = _patch_pool_matrix()                     # (16, 224)
    m_h = p @ a_h                                # (16, h)
    m_w = a_w.T @ p.T                            # (w, 16)
    return m_h.astype(np.float32), m_w.astype(np.float32)


# ----------------------------------------------------------------------------
# Kernel 1: fused bilinear-resize + token-mean pool via composed matrices.
#   per block of nb images:  pooled[n] = M_h @ x[n] @ M_w   (16 x 16)
# bf16 operands, f32 accumulation; no per-image Python unroll.
# ----------------------------------------------------------------------------
def resize_pool_kernel(x_ref, mw_ref, mhb_ref, o_ref):
    nb, h, w = x_ref.shape
    # W-contraction for the whole block as ONE MXU matmul (leading-dim merge
    # reshape is layout-preserving): (nb*h, w) @ (w, 16) -> f32.
    x2 = x_ref[...].reshape(nb * h, w)
    t = jnp.dot(x2, mw_ref[...], preferred_element_type=jnp.float32)
    # H-contraction as a batched matmul: (nb, 16, h) @ (nb, h, 16) -> (nb,16,16).
    t3 = t.reshape(nb, h, PATCH).astype(jnp.bfloat16)
    pooled = jnp.einsum("noh,nhp->nop", mhb_ref[...], t3,
                        preferred_element_type=jnp.float32)
    # Output is only 1 KiB per image and the kernel is input-DMA bound, so the
    # 16-wide (masked) store is negligible; keeping (nb,16,16) avoids an
    # in-kernel minor-dim-merge relayout.
    o_ref[...] = pooled


def _choose_image_block(bc, h, w):
    """VMEM-budget-derived images-per-step (review: no hard-coded nb=8)."""
    bytes_per_img = h * w * 2                    # bf16 input
    budget = 4 << 20                             # per in-flight input buffer (x2 double-buffered)
    nb = int(min(bc, 256, max(1, budget // bytes_per_img)))
    if nb < bc and nb >= 8:
        nb = (nb // 8) * 8                       # sublane-friendly
    if bc >= 16:                                 # give v7x's 2nd TC >= 2 parallel tiles
        nb = min(nb, max(8, ((bc + 1) // 2) // 8 * 8))
    return max(1, min(nb, bc))


def resize_and_pool(x):
    b, c, h, w = x.shape
    bc = b * c
    x_flat = x.reshape(bc, h, w).astype(jnp.bfloat16)
    m_h, m_w = _pool_resize_factors(h, w)
    nb = _choose_image_block(bc, h, w)
    # M_h pre-broadcast on the host to (nb, 16, h) so the batched matmul sees a
    # plain VMEM operand (fetched once: constant index_map).
    m_h_b = np.broadcast_to(m_h[None], (nb, PATCH, h))

    pooled = pl.pallas_call(
        resize_pool_kernel,
        out_shape=jax.ShapeDtypeStruct((bc, PATCH, PATCH), jnp.float32),
        grid=(pl.cdiv(bc, nb),),
        in_specs=[
            pl.BlockSpec((nb, h, w), lambda i: (i, 0, 0)),
            pl.BlockSpec((w, PATCH), lambda i: (0, 0)),
            pl.BlockSpec((nb, PATCH, h), lambda i: (0, 0, 0)),
        ],
        out_specs=pl.BlockSpec((nb, PATCH, PATCH), lambda i: (i, 0, 0)),
        compiler_params=pltpu.CompilerParams(
            dimension_semantics=("parallel",),
            vmem_limit_bytes=32 << 20),
    )(x_flat,
      jnp.asarray(m_w, jnp.bfloat16),
      jnp.asarray(m_h_b, jnp.bfloat16))
    return pooled.reshape(b, c, PPF)             # (B, C, 256), (ph, pw) order


# ----------------------------------------------------------------------------
# Kernel 2: single GEMM for the folded (patch-embed @ heads) linear chain.
#   out = feats @ W_fold + b_fold,   W_fold (K, 128) resident in VMEM.
# bf16 operands, f32 accumulation, lane-dense 128-wide output.
# ----------------------------------------------------------------------------
def head_kernel(f_ref, w_ref, b_ref, o_ref):
    o_ref[...] = jnp.dot(f_ref[...], w_ref[...],
                         preferred_element_type=jnp.float32) + b_ref[...]


def fused_head(feats, w_fold, b_fold):
    b, k = feats.shape
    if b >= 16:
        tb = min(128, max(8, ((b // 2) // 8) * 8))   # >=2 parallel tiles (v7x)
    else:
        tb = b
    out = pl.pallas_call(
        head_kernel,
        out_shape=jax.ShapeDtypeStruct((b, HEAD_PAD), jnp.float32),
        grid=(pl.cdiv(b, tb),),
        in_specs=[
            pl.BlockSpec((tb, k), lambda i: (i, 0)),
            pl.BlockSpec((k, HEAD_PAD), lambda i: (0, 0)),      # weight resident
            pl.BlockSpec((1, HEAD_PAD), lambda i: (0, 0)),      # bias resident
        ],
        out_specs=pl.BlockSpec((tb, HEAD_PAD), lambda i: (i, 0)),
        compiler_params=pltpu.CompilerParams(
            dimension_semantics=("parallel",),
            vmem_limit_bytes=32 << 20),
    )(feats.astype(jnp.bfloat16), w_fold.astype(jnp.bfloat16), b_fold)
    return out                                    # (B, 128); real outputs in [:, :8]


# ----------------------------------------------------------------------------
# Full forward
# ----------------------------------------------------------------------------
def mamba_classifier_forward(x, folded):
    b, c = x.shape[0], x.shape[1]
    pooled = resize_and_pool(x)                   # (B, C, 256) f32
    w_fold, b_fold = folded["w_fold"], folded["b_fold"]
    if c == 1:
        # x.repeat(1,3,1,1) through the linear stand-in backbone == summing the
        # three per-channel blocks of the folded weight (no data broadcast).
        w_used = w_fold[0:PPF] + w_fold[PPF:2 * PPF] + w_fold[2 * PPF:3 * PPF]
        feats = pooled.reshape(b, PPF)
    else:
        w_used = w_fold                           # expects c == 3
        feats = pooled.reshape(b, c * PPF)
    head = fused_head(feats, w_used, b_fold)      # (B, 128)
    return {
        "energy_loss_output": head[:, 0:1],
        "alpha_output": head[:, 1:4],
        "q0_output": head[:, 4:8],
    }


def init_params(key):
    """Natural parameterization matching the PyTorch module's heads + a linear
    patch-embed stand-in for the backbone."""
    patch_dim = 3 * PPF                           # 768
    k1, k2, k3, k4 = jax.random.split(key, 4)
    return {
        "w_patch": 0.02 * jax.random.normal(k1, (patch_dim, NUM_FEATURES), jnp.float32),
        "b_patch": 0.01 * jax.random.normal(k2, (1, NUM_FEATURES), jnp.float32),
        "w_heads": 0.02 * jax.random.normal(k3, (NUM_FEATURES, HEAD_OUT), jnp.float32),
        "b_heads": 0.01 * jax.random.normal(k4, (1, HEAD_OUT), jnp.float32),
    }


def fold_params(params):
    """Host-side, once: fold patch-embed and heads into one (768,128) GEMM.
    Only valid because the stand-in backbone is linear (see TODO above)."""
    w_heads_pad = jnp.zeros((NUM_FEATURES, HEAD_PAD), jnp.float32)
    w_heads_pad = w_heads_pad.at[:, :HEAD_OUT].set(params["w_heads"])
    b_heads_pad = jnp.zeros((1, HEAD_PAD), jnp.float32)
    b_heads_pad = b_heads_pad.at[:, :HEAD_OUT].set(params["b_heads"])
    w_fold = params["w_patch"] @ w_heads_pad                  # (768, 128) f32
    b_fold = params["b_patch"] @ w_heads_pad + b_heads_pad    # (1, 128)   f32
    return {"w_fold": w_fold, "b_fold": b_fold}


if __name__ == "__main__":
    key = jax.random.PRNGKey(0)
    k_x1, k_x3, k_p = jax.random.split(key, 3)
    params = init_params(k_p)
    folded = fold_params(params)                  # folded once, outside jit
    fwd = jax.jit(mamba_classifier_forward)

    # 1-channel input exercises the repeat(1,3,1,1) path.
    x1 = jax.random.normal(k_x1, (2, 1, 16, 16), jnp.float32)
    out1 = jax.block_until_ready(fwd(x1, folded))
    assert out1["energy_loss_output"].shape == (2, 1)
    assert out1["alpha_output"].shape == (2, 3)
    assert out1["q0_output"].shape == (2, 4)

    # 3-channel input exercises the native path.
    x3 = jax.random.normal(k_x3, (2, 3, 16, 16), jnp.float32)
    out3 = jax.block_until_ready(fwd(x3, folded))
    assert out3["energy_loss_output"].shape == (2, 1)
    assert out3["alpha_output"].shape == (2, 3)
    assert out3["q0_output"].shape == (2, 4)

    print("KERNEL_OK")
</pallas_src>

<mosaic_0001>
module attributes {stable_mosaic.version = 11 : i64} {
  func.func @head_kernel(%arg0: i32, %arg1: memref<2x256xbf16, #tpu.memory_space<vmem>>, %arg2: memref<256x128xbf16, #tpu.memory_space<vmem>>, %arg3: memref<1x128xf32, #tpu.memory_space<vmem>>, %arg4: memref<2x128xf32, #tpu.memory_space<vmem>>) attributes {dimension_semantics = [#tpu.dimension_semantics<parallel>], iteration_bounds = array<i64: 1>, scalar_prefetch = 0 : i64, scratch_operands = 0 : i64, tpu.core_type = #tpu.core_type<tc>, window_params = [{transform_indices = @transform_0, window_bounds = array<i64: 2, 256>}, {pipeline_mode = #tpu.pipeline_mode<synchronous>, transform_indices = @transform_1, window_bounds = array<i64: 256, 128>}, {pipeline_mode = #tpu.pipeline_mode<synchronous>, transform_indices = @transform_2, window_bounds = array<i64: 1, 128>}, {transform_indices = @transform_3, window_bounds = array<i64: 2, 128>}]} {
    %c0 = arith.constant 0 : index
    %c0_0 = arith.constant 0 : index
    %0 = vector.load %arg1[%c0, %c0_0] : memref<2x256xbf16, #tpu.memory_space<vmem>>, vector<2x256xbf16>
    %c0_1 = arith.constant 0 : index
    %c0_2 = arith.constant 0 : index
    %1 = vector.load %arg2[%c0_1, %c0_2] : memref<256x128xbf16, #tpu.memory_space<vmem>>, vector<256x128xbf16>
    %cst = arith.constant dense<0.000000e+00> : vector<2x128xf32>
    %2 = tpu.matmul %0, %1, %cst {dimension_numbers = #tpu.dot_dimension_numbers<[1], [0], [0], [1], [0, 0, 1, 1], [], []>} : vector<2x256xbf16>, vector<256x128xbf16>, vector<2x128xf32> -> vector<2x128xf32>
    %c0_3 = arith.constant 0 : index
    %c0_4 = arith.constant 0 : index
    %3 = vector.load %arg3[%c0_3, %c0_4] : memref<1x128xf32, #tpu.memory_space<vmem>>, vector<1x128xf32>
    %4 = vector.broadcast %3 : vector<1x128xf32> to vector<2x128xf32>
    %5 = arith.addf %2, %4 : vector<2x128xf32>
    %c0_5 = arith.constant 0 : index
    %c0_6 = arith.constant 0 : index
    %6 = vector.load %arg4[%c0_5, %c0_6] : memref<2x128xf32, #tpu.memory_space<vmem>>, vector<2x128xf32>
    tpu.vector_store %arg4[%c0_5, %c0_6], %5 {strides = array<i32>} : memref<2x128xf32, #tpu.memory_space<vmem>>, vector<2x128xf32>,
    return
  }
  func.func @transform_0(%arg0: i32) -> (i32, i32) {
    %c0_i32 = arith.constant 0 : i32
    %c0_i32_0 = arith.constant 0 : i32
    return %arg0, %c0_i32 : i32, i32
  }
  func.func @transform_1(%arg0: i32) -> (i32, i32) {
    %c0_i32 = arith.constant 0 : i32
    %c0_i32_0 = arith.constant 0 : i32
    %c0_i32_1 = arith.constant 0 : i32
    return %c0_i32, %c0_i32_0 : i32, i32
  }
  func.func @transform_2(%arg0: i32) -> (i32, i32) {
    %c0_i32 = arith.constant 0 : i32
    %c0_i32_0 = arith.constant 0 : i32
    %c0_i32_1 = arith.constant 0 : i32
    return %c0_i32, %c0_i32_0 : i32, i32
  }
  func.func @transform_3(%arg0: i32) -> (i32, i32) {
    %c0_i32 = arith.constant 0 : i32
    %c0_i32_0 = arith.constant 0 : i32
    return %arg0, %c0_i32 : i32, i32
  }
}

module attributes {stable_mosaic.version = 11 : i64} {
  func.func @resize_pool_kernel(%arg0: i32, %arg1: memref<2x16x16xbf16, #tpu.memory_space<vmem>>, %arg2: memref<16x16xbf16, #tpu.memory_space<vmem>>, %arg3: memref<2x16x16xbf16, #tpu.memory_space<vmem>>, %arg4: memref<2x16x16xf32, #tpu.memory_space<vmem>>) attributes {dimension_semantics = [#tpu.dimension_semantics<parallel>], iteration_bounds = array<i64: 1>, scalar_prefetch = 0 : i64, scratch_operands = 0 : i64, tpu.core_type = #tpu.core_type<tc>, window_params = [{transform_indices = @transform_0, window_bounds = array<i64: 2, 16, 16>}, {pipeline_mode = #tpu.pipeline_mode<synchronous>, transform_indices = @transform_1, window_bounds = array<i64: 16, 16>}, {pipeline_mode = #tpu.pipeline_mode<synchronous>, transform_indices = @transform_2, window_bounds = array<i64: 2, 16, 16>}, {transform_indices = @transform_3, window_bounds = array<i64: 2, 16, 16>}]} {
    %c0 = arith.constant 0 : index
    %c0_0 = arith.constant 0 : index
    %c0_1 = arith.constant 0 : index
    %0 = vector.load %arg1[%c0, %c0_0, %c0_1] : memref<2x16x16xbf16, #tpu.memory_space<vmem>>, vector<2x16x16xbf16>
    %1 = vector.shape_cast %0 : vector<2x16x16xbf16> to vector<32x16xbf16>
    %c0_2 = arith.constant 0 : index
    %c0_3 = arith.constant 0 : index
    %2 = vector.load %arg2[%c0_2, %c0_3] : memref<16x16xbf16, #tpu.memory_space<vmem>>, vector<16x16xbf16>
    %cst = arith.constant dense<0.000000e+00> : vector<32x16xf32>
    %3 = tpu.matmul %1, %2, %cst {dimension_numbers = #tpu.dot_dimension_numbers<[1], [0], [0], [1], [0, 0, 1, 1], [], []>} : vector<32x16xbf16>, vector<16x16xbf16>, vector<32x16xf32> -> vector<32x16xf32>
    %4 = vector.shape_cast %3 : vector<32x16xf32> to vector<2x16x16xf32>
    %5 = arith.truncf %4 : vector<2x16x16xf32> to vector<2x16x16xbf16>
    %c0_4 = arith.constant 0 : index
    %c0_5 = arith.constant 0 : index
    %c0_6 = arith.constant 0 : index
    %6 = vector.load %arg3[%c0_4, %c0_5, %c0_6] : memref<2x16x16xbf16, #tpu.memory_space<vmem>>, vector<2x16x16xbf16>
    "tpu.trace_start"() <{level = 10 : i32, message = "noh,nhp->nop"}> : () -> ()
    %cst_7 = arith.constant dense<0.000000e+00> : vector<2x16x16xf32>
    %7 = tpu.matmul %6, %5, %cst_7 {dimension_numbers = #tpu.dot_dimension_numbers<[2], [1], [1], [2], [0, 0, 0, 1, 1, 2], [0], [0]>} : vector<2x16x16xbf16>, vector<2x16x16xbf16>, vector<2x16x16xf32> -> vector<2x16x16xf32>
    "tpu.trace_stop"() : () -> ()
    %c0_8 = arith.constant 0 : index
    %c0_9 = arith.constant 0 : index
    %c0_10 = arith.constant 0 : index
    %8 = vector.load %arg4[%c0_8, %c0_9, %c0_10] : memref<2x16x16xf32, #tpu.memory_space<vmem>>, vector<2x16x16xf32>
    tpu.vector_store %arg4[%c0_8, %c0_9, %c0_10], %7 {strides = array<i32>} : memref<2x16x16xf32, #tpu.memory_space<vmem>>, vector<2x16x16xf32>,
    return
  }
  func.func @transform_0(%arg0: i32) -> (i32, i32, i32) {
    %c0_i32 = arith.constant 0 : i32
    %c0_i32_0 = arith.constant 0 : i32
    %c0_i32_1 = arith.constant 0 : i32
    return %arg0, %c0_i32, %c0_i32_0 : i32, i32, i32
  }
  func.func @transform_1(%arg0: i32) -> (i32, i32) {
    %c0_i32 = arith.constant 0 : i32
    %c0_i32_0 = arith.constant 0 : i32
    %c0_i32_1 = arith.constant 0 : i32
    return %c0_i32, %c0_i32_0 : i32, i32
  }
  func.func @transform_2(%arg0: i32) -> (i32, i32, i32) {
    %c0_i32 = arith.constant 0 : i32
    %c0_i32_0 = arith.constant 0 : i32
    %c0_i32_1 = arith.constant 0 : i32
    %c0_i32_2 = arith.constant 0 : i32
    return %c0_i32, %c0_i32_0, %c0_i32_1 : i32, i32, i32
  }
  func.func @transform_3(%arg0: i32) -> (i32, i32, i32) {
    %c0_i32 = arith.constant 0 : i32
    %c0_i32_0 = arith.constant 0 : i32
    %c0_i32_1 = arith.constant 0 : i32
    return %arg0, %c0_i32, %c0_i32_0 : i32, i32, i32
  }
}

</mosaic_0001>

<bundles_post_ra>
// kernel: mamba_classifier_forward.3
= control target key start
LH: loop header
LB: loop body
LE: loop exit
PB: predicated region body
PF: predicated region fallthrough
CT: control target
= control target key end

     0   :  { %s342_s1 = inlined_call_operand.vmem [shape: bf16[256,128], index: 1, kind: input, shape index: {}]   ;;  %s343_s0 = inlined_call_operand.vmem [shape: bf16[2,256], index: 0, kind: input, shape index: {}]   ;;  %s344_s2 = inlined_call_operand.vmem [shape: f32[1,128], index: 2, kind: input, shape index: {}]   ;;  %s345_s3 = inlined_call_operand.vmem [shape: f32[2,128], index: 3, kind: output, shape index: {}]  }
   0x1   :  { %v255_v0 = vld [vmem:[%s342_s1 + $0x38] sm:$0xff]  ;;  %v254_v2 = vld [vmem:[%s342_s1 + $0x30] sm:$0xff]  ;;  %v14_v4 = vld [vmem:[%s343_s0] sm:$0x3] }
   0x2   :  { %v263_v1 = vld [vmem:[%s342_s1 + $0x78] sm:$0xff]  ;;  %153 = vmatpush.bf16.msra.mxu0 %v255_v0  ;;  %v262_v3 = vld [vmem:[%s342_s1 + $0x70] sm:$0xff]  ;;  %v253_v5 = vld [vmem:[%s342_s1 + $0x28] sm:$0xff]  ;;  %52 = vst [vmem:[#allocation1] ss:$9 sm:$0xff] %v14_v4 }
   0x3   :  { %166 = vmatpush.bf16.msra.mxu1 %v263_v1  ;;  %v261_v6 = vld [vmem:[%s342_s1 + $0x68] sm:$0xff]  ;;  %v252_v7 = vld [vmem:[%s342_s1 + $0x20] sm:$0xff]  ;;  %v251_v9 = vld [vmem:[%s342_s1 + $0x18] sm:$0xff] }
   0x4   :  { %v260_v8 = vld [vmem:[%s342_s1 + $0x60] sm:$0xff]  ;;  %v259_v10 = vld [vmem:[%s342_s1 + $0x58] sm:$0xff]  ;;  %v250_v11 = vld [vmem:[%s342_s1 + $0x10] sm:$0xff] }
   0x5   :  { %v258_v12 = vld [vmem:[%s342_s1 + $0x50] sm:$0xff]  ;;  %v249_v13 = vld [vmem:[%s342_s1 + $0x8] sm:$0xff]  ;;  %v248_v15 = vld [vmem:[%s342_s1] sm:$0xff] }
   0x6   :  { %154 = vmatpush.bf16.msra.mxu0 %v254_v2  ;;  %v257_v14 = vld [vmem:[%s342_s1 + $0x48] sm:$0xff]  ;;  %v256_v16 = vld [vmem:[%s342_s1 + $0x40] sm:$0xff] }
   0x7   :  { %167 = vmatpush.bf16.msra.mxu1 %v262_v3  ;;  %v264_v19 = vld [vmem:[%s344_s2] ss:$0 sm:$0xff] }
   0x9   :  { %v53_v17 = vld [vmem:[#allocation1] sm:$0xff]  ;;  %v54_v18 = vld [vmem:[#allocation1 + $0x9] sm:$0xff] }
   0xa   :  { %155 = vmatpush.bf16.msra.mxu0 %v253_v5 }
   0xb   :  { %168 = vmatpush.bf16.msra.mxu1 %v261_v6 }
   0xe   :  { %156 = vmatpush.bf16.msra.mxu0 %v252_v7 }
   0xf   :  { %169 = vmatpush.bf16.msra.mxu1 %v260_v8 }
  0x12   :  { %157 = vmatpush.bf16.msra.mxu0 %v251_v9 }
  0x13   :  { %170 = vmatpush.bf16.msra.mxu1 %v259_v10 }
  0x16   :  { %158 = vmatpush.bf16.msra.mxu0 %v250_v11 }
  0x17   :  { %171 = vmatpush.bf16.msra.mxu1 %v258_v12 }
  0x1a   :  { %159 = vmatpush.bf16.msra.mxu0 %v249_v13 }
  0x1b   :  { %172 = vmatpush.bf16.msra.mxu1 %v257_v14 }
  0x1e   :  { %160 = vmatpush.bf16.msra.mxu0 %v248_v15 }
  0x1f   :  { %173 = vmatpush.bf16.msra.mxu1 %v256_v16 }
  0x21   :  { %161 = vmatmul.bf16.vlgmr.msra.gmra.mxu0 %v53_v17 }
  0x22   :  { %174 = vmatmul.bf16.vlgmr.msra.gmra.mxu1 %v54_v18 }
  0x9e   :  { %v162_v20 = vpop.f32.mrf.mxu0 }
  0x9f   :  { %v175_v21 = vpop.f32.mrf.mxu1  ;;  %v163_v22 = vadd.f32 %v264_v19, %v162_v20 }
  0xa1   :  { %v176_v23 = vadd.f32 %v175_v21, %v163_v22 }
  0xa3   :  { %179 = vst [vmem:[%s345_s3] sm:$0x3] %v176_v23 }
  0xa6   :  { %v164_v24 = vpop.f32.mrf.mxu0 }
  0xa7   :  { %v177_v25 = vpop.f32.mrf.mxu1 }

// kernel: mamba_classifier_forward.2
= control target key start
LH: loop header
LB: loop body
LE: loop exit
PB: predicated region body
PF: predicated region fallthrough
CT: control target
= control target key end

     0   :  { %vm37_vm0 = vcmask 130048   ;;  %s220_s1 = inlined_call_operand.vmem [shape: bf16[16,16], index: 1, kind: input, shape index: {}]   ;;  %s221_s0 = inlined_call_operand.vmem [shape: bf16[2,16,16], index: 0, kind: input, shape index: {}]   ;;  %s222_s2 = inlined_call_operand.vmem [shape: bf16[2,16,16], index: 2, kind: input, shape index: {}]   ;;  %s223_s3 = inlined_call_operand.vmem [shape: f32[2,16,16], index: 3, kind: output, shape index: {}]  }
   0x1   :  { %v161_v0 = vld [vmem:[%s220_s1] sm:$0xff]  ;;  %v160_v1 = vld [vmem:[%s221_s0 + $0x8] sm:$0xff] }
   0x2   :  { %v159_v2 = vld [vmem:[%s221_s0] sm:$0xff]  ;;  %164 = vmatpush.bf16.msra.mxu3 %v161_v0  ;;  %51 = vmatpush.bf16.msra.mxu0 %v161_v0  ;;  %v163_v18 = vld [vmem:[%s222_s2 + $0x8] sm:$0xff] }
   0x3   :  { %v162_v13 = vld [vmem:[%s222_s2] sm:$0xff] }
   0x5   :  { %148 = vmatmul.msk.bf16.vlgmr.msra.gmra.mxu3 %vm37_vm0, %v160_v1  ;;  %147 = vmatmul.msk.bf16.vlgmr.msra.gmra.mxu0 %vm37_vm0, %v159_v2 }
  0x82   :  { %v53_v3 = vpop.f32.mrf.mxu0 }
  0x83   :  { %v63_v4 = vpack.c.bf16 %v53_v3, %v53_v3 }
  0x85   :  { %v78_v7 = vunpack.c.l.b16 %v63_v4 }
  0x88   :  { %v58_v5 = vpop.f32.mrf.mxu3 }
  0x89   :  { %v65_v10 = vpack.c.bf16 %v58_v5, %v58_v5 }
  0x8a   :  { %v55_v6 = vpop.f32.mrf.mxu0 }
  0x8b   :  { %v64_v8 = vpack.c.bf16 %v55_v6, %v55_v6  ;;  %v106_v15 = vunpack.c.l.b16 %v65_v10 }
  0x8d   :  { %v79_v9 = vunpack.c.l.b16 %v64_v8 }
  0x8f   :  { %v80_v11 = vpack.c.b16 %v79_v9, %v78_v7 }
  0x90   :  { %v60_v12 = vpop.f32.mrf.mxu3 }
  0x91   :  { %v66_v14 = vpack.c.bf16 %v60_v12, %v60_v12  ;;  %92 = vmatpush.bf16.msra.mxu1 %v80_v11 }
  0x93   :  { %v107_v16 = vunpack.c.l.b16 %v66_v14 }
  0x94   :  { %153 = vmatmul.msk.bf16.vlgmr.msra.gmra.mxu1 %vm37_vm0, %v162_v13 }
  0x95   :  { %v108_v17 = vpack.c.b16 %v107_v16, %v106_v15 }
  0x97   :  { %120 = vmatpush.bf16.msra.mxu2 %v108_v17 }
  0x9a   :  { %158 = vmatmul.msk.bf16.vlgmr.msra.gmra.mxu2 %vm37_vm0, %v163_v18 }
 0x111   :  { %v94_v19 = vpop.f32.mrf.mxu1 }
 0x112   :  { %127 = vst.msk [vmem:[%s223_s3] sm:$0xff] %vm37_vm0, %v94_v19 }
 0x119   :  { %v96_v20 = vpop.f32.mrf.mxu1 }
 0x11a   :  { %128 = vst.msk [vmem:[%s223_s3 + $0x8] sm:$0xff] %vm37_vm0, %v96_v20 }
 0x11d   :  { %v122_v21 = vpop.f32.mrf.mxu2 }
 0x11e   :  { %129 = vst.msk [vmem:[%s223_s3 + $0x10] sm:$0xff] %vm37_vm0, %v122_v21 }
 0x125   :  { %v124_v22 = vpop.f32.mrf.mxu2 }
 0x126   :  { %130 = vst.msk [vmem:[%s223_s3 + $0x18] sm:$0xff] %vm37_vm0, %v124_v22 }

</bundles_post_ra>
